<compile_context>
chip_gen: v7x
topology: tpu7x:2x2x1
jax: 0.10.0
libtpu: 0.0.40
codegen_flags: <defaults>
</compile_context>

<pallas_src>
import functools

import jax
import jax.numpy as jnp
import numpy as np
from jax.experimental import pallas as pl
from jax.experimental.pallas import tpu as pltpu

LANE = 128  # TPU lane width — output slab is padded to a multiple of this.


# ----------------------------- Pallas kernel -----------------------------

def _task_block_kernel(x_ref, w1_ref, b1_ref, w2_ref, b2_ref, o_ref):
    """Fused Linear -> ReLU -> Linear for the whole batch in one block.

    x_ref:  (B, Din)    f32
    w1_ref: (Din, H)    bf16      b1_ref: (1, H)    f32
    w2_ref: (H, Cpad)   bf16      b2_ref: (1, Cpad) f32
    o_ref:  (B, Cpad)   f32
    """
    # First Linear: MXU matmul in bf16 inputs / f32 accumulation.
    x = x_ref[...].astype(jnp.bfloat16)
    h = jnp.dot(x, w1_ref[...], preferred_element_type=jnp.float32)
    # Bias + ReLU epilogue stays in f32 (VPU fast path on all generations).
    h = jnp.maximum(h + b1_ref[...], 0.0)
    # Second Linear: cast only for the MXU op, accumulate + bias in f32.
    y = jnp.dot(h.astype(jnp.bfloat16), w2_ref[...],
                preferred_element_type=jnp.float32) + b2_ref[...]
    o_ref[...] = y.astype(o_ref.dtype)


# ----------------------------- Wrapper -----------------------------

@functools.partial(jax.jit, static_argnames=("num_classes",))
def task1_forward(params, x, *, num_classes):
    """x: (B, int(64*kernel_size)) -> (B, num_classes). Single fused pallas_call."""
    B, din = x.shape
    hid = params["w1"].shape[1]
    cpad = params["w2"].shape[1]

    vmem = pl.BlockSpec(memory_space=pltpu.MemorySpace.VMEM)

    flops = 2 * B * (din * hid + hid * cpad)
    bytes_accessed = (
        x.size * x.dtype.itemsize
        + params["w1"].size * params["w1"].dtype.itemsize
        + params["b1"].size * params["b1"].dtype.itemsize
        + params["w2"].size * params["w2"].dtype.itemsize
        + params["b2"].size * params["b2"].dtype.itemsize
        + B * cpad * 4
    )

    out = pl.pallas_call(
        _task_block_kernel,
        out_shape=jax.ShapeDtypeStruct((B, cpad), jnp.float32),
        in_specs=[vmem] * 5,
        out_specs=vmem,
        cost_estimate=pl.CostEstimate(
            flops=flops, transcendentals=0, bytes_accessed=bytes_accessed),
    )(x, params["w1"], params["b1"], params["w2"], params["b2"])
    # Slice the lane-dense (B, 128) slab back to the logical class count.
    return out[:, :num_classes]


# ----------------------------- Parameters -----------------------------

def init_task1_params(key, kernel_size, num_classes):
    """PyTorch Linear default init (U(-1/sqrt(fan_in), +1/sqrt(fan_in))).

    Weights are stored pre-transposed as (in, out) in bf16, biases as (1, out)
    in f32, and the second layer's output dim is zero-padded to a multiple of
    128 lanes — all folded at init so the forward has zero per-call reshaping.
    """
    din = int(64 * kernel_size)
    hid = int(256 * kernel_size)
    cpad = ((num_classes + LANE - 1) // LANE) * LANE

    k1, k2, k3, k4 = jax.random.split(key, 4)
    lim1 = 1.0 / np.sqrt(din)
    lim2 = 1.0 / np.sqrt(hid)
    w1 = jax.random.uniform(k1, (din, hid), jnp.float32, -lim1, lim1)
    b1 = jax.random.uniform(k2, (1, hid), jnp.float32, -lim1, lim1)
    w2 = jax.random.uniform(k3, (hid, num_classes), jnp.float32, -lim2, lim2)
    b2 = jax.random.uniform(k4, (1, num_classes), jnp.float32, -lim2, lim2)

    w2p = jnp.zeros((hid, cpad), jnp.float32).at[:, :num_classes].set(w2)
    b2p = jnp.zeros((1, cpad), jnp.float32).at[:, :num_classes].set(b2)

    return dict(
        w1=w1.astype(jnp.bfloat16),   # bf16 weights: MXU-native, half the DMA bytes
        b1=b1,                        # f32 bias: epilogue stays f32
        w2=w2p.astype(jnp.bfloat16),
        b2=b2p,
    )


# ----------------------------- Pure-JAX reference -----------------------------

def ref_task1(params, x, num_classes):
    w1 = params["w1"].astype(jnp.float32)
    w2 = params["w2"].astype(jnp.float32)
    h = jnp.maximum(x @ w1 + params["b1"], 0.0)
    y = h @ w2 + params["b2"]
    return y[:, :num_classes]


# ----------------------------- Main -----------------------------

if __name__ == "__main__":
    key = jax.random.PRNGKey(0)
    kp, kx = jax.random.split(key)

    # Task_1_output_end(kernel_size=0.5, filter_size=1, num_classes=4)
    #   -> Linear(32, 128) -> ReLU -> Linear(128, 4)
    kernel_size, filter_size, num_classes = 0.5, 1, 4  # filter_size unused by this module
    params = init_task1_params(kp, kernel_size, num_classes)

    B = 8
    din = int(64 * kernel_size)
    x = jax.random.normal(kx, (B, din), jnp.float32)

    out = jax.block_until_ready(task1_forward(params, x, num_classes=num_classes))
    ref = jax.block_until_ready(ref_task1(params, x, num_classes))

    assert out.shape == (B, num_classes), out.shape
    # Tolerance covers the bf16-input MXU path (activations truncated to bf16,
    # f32 accumulation) vs the f32 reference built from the same bf16 weights.
    np.testing.assert_allclose(np.asarray(out), np.asarray(ref), rtol=2e-2, atol=2e-2)
    print("KERNEL_OK")

# TODO(synk): Training-mode behaviour (none beyond Linear/ReLU here) is not
# modeled; the module is pure Linear->ReLU->Linear in eval mode.
</pallas_src>

<mosaic_0001>
module attributes {stable_mosaic.version = 11 : i64} {
  func.func @_task_block_kernel(%arg0: memref<8x32xf32, #tpu.memory_space<vmem>>, %arg1: memref<32x128xbf16, #tpu.memory_space<vmem>>, %arg2: memref<1x128xf32, #tpu.memory_space<vmem>>, %arg3: memref<128x128xbf16, #tpu.memory_space<vmem>>, %arg4: memref<1x128xf32, #tpu.memory_space<vmem>>, %arg5: memref<8x128xf32, #tpu.memory_space<vmem>>) attributes {dimension_semantics = [], scalar_prefetch = 0 : i64, scratch_operands = 0 : i64, tpu.core_type = #tpu.core_type<tc>} {
    %c0 = arith.constant 0 : index
    %c0_0 = arith.constant 0 : index
    %0 = vector.load %arg0[%c0, %c0_0] : memref<8x32xf32, #tpu.memory_space<vmem>>, vector<8x32xf32>
    %1 = arith.truncf %0 : vector<8x32xf32> to vector<8x32xbf16>
    %c0_1 = arith.constant 0 : index
    %c0_2 = arith.constant 0 : index
    %2 = vector.load %arg1[%c0_1, %c0_2] : memref<32x128xbf16, #tpu.memory_space<vmem>>, vector<32x128xbf16>
    %cst = arith.constant dense<0.000000e+00> : vector<8x128xf32>
    %3 = tpu.matmul %1, %2, %cst {dimension_numbers = #tpu.dot_dimension_numbers<[1], [0], [0], [1], [0, 0, 1, 1], [], []>} : vector<8x32xbf16>, vector<32x128xbf16>, vector<8x128xf32> -> vector<8x128xf32>
    %c0_3 = arith.constant 0 : index
    %c0_4 = arith.constant 0 : index
    %4 = vector.load %arg2[%c0_3, %c0_4] : memref<1x128xf32, #tpu.memory_space<vmem>>, vector<1x128xf32>
    %5 = vector.broadcast %4 : vector<1x128xf32> to vector<8x128xf32>
    %6 = arith.addf %3, %5 : vector<8x128xf32>
    %cst_5 = arith.constant 0.000000e+00 : f32
    %7 = vector.broadcast %cst_5 : f32 to vector<8x128xf32>
    %8 = arith.maximumf %6, %7 : vector<8x128xf32>
    %9 = arith.truncf %8 : vector<8x128xf32> to vector<8x128xbf16>
    %c0_6 = arith.constant 0 : index
    %c0_7 = arith.constant 0 : index
    %10 = vector.load %arg3[%c0_6, %c0_7] : memref<128x128xbf16, #tpu.memory_space<vmem>>, vector<128x128xbf16>
    %cst_8 = arith.constant dense<0.000000e+00> : vector<8x128xf32>
    %11 = tpu.matmul %9, %10, %cst_8 {dimension_numbers = #tpu.dot_dimension_numbers<[1], [0], [0], [1], [0, 0, 1, 1], [], []>} : vector<8x128xbf16>, vector<128x128xbf16>, vector<8x128xf32> -> vector<8x128xf32>
    %c0_9 = arith.constant 0 : index
    %c0_10 = arith.constant 0 : index
    %12 = vector.load %arg4[%c0_9, %c0_10] : memref<1x128xf32, #tpu.memory_space<vmem>>, vector<1x128xf32>
    %13 = vector.broadcast %12 : vector<1x128xf32> to vector<8x128xf32>
    %14 = arith.addf %11, %13 : vector<8x128xf32>
    %c0_11 = arith.constant 0 : index
    %c0_12 = arith.constant 0 : index
    %15 = vector.load %arg5[%c0_11, %c0_12] : memref<8x128xf32, #tpu.memory_space<vmem>>, vector<8x128xf32>
    tpu.vector_store %arg5[%c0_11, %c0_12], %14 {strides = array<i32>} : memref<8x128xf32, #tpu.memory_space<vmem>>, vector<8x128xf32>,
    return
  }
}

</mosaic_0001>

<bundles_post_ra>
// kernel: task1_forward.1
= control target key start
LH: loop header
LB: loop body
LE: loop exit
PB: predicated region body
PF: predicated region fallthrough
CT: control target
= control target key end

     0   :  { %10 = vsyncpa [#allocation3], 0  ;;  %s478_s0 = inlined_call_operand.vmem [shape: f32[8,32], index: 0, kind: input, shape index: {}]   ;;  %s479_s1 = inlined_call_operand.hbm [shape: bf16[32,128], index: 1, kind: input, shape index: {}]   ;;  %s480_s2 = inlined_call_operand.hbm [shape: f32[1,128], index: 2, kind: input, shape index: {}]   ;;  %s481_s3 = inlined_call_operand.hbm [shape: bf16[128,128], index: 3, kind: input, shape index: {}]   ;;  %s482_s4 = inlined_call_operand.vmem [shape: f32[1,128], index: 4, kind: input, shape index: {}]   ;;  %s483_s5 = inlined_call_operand.vmem [shape: f32[8,128], index: 5, kind: output, shape index: {}]  }
   0x1   :  { %11 = vsyncpa [#allocation5], 0  ;;  %s389_s18 = smov [#allocation4]   ;;  %s390_s20 = smov [#allocation2]  }
   0x2   :  { %s32_s19 = sshll.u32 %s389_s18, 4  ;;  %s19_s21 = sshll.u32 %s390_s20, 4  ;;  %s33_s19 = int_to_ptr.vmem [resolvable:$true] %s32_s19  ;;  %s426_s21 = int_to_ptr.vmem [resolvable:$true] %s19_s21 }
   0x3   :  { %s319_s24 = scalar_lea.hbm %s480_s2, 16 }
   0x4   :  { %p320_p0 = scmp.ne.s32.totalorder %s480_s2, %s319_s24  ;;  %p323_p1 = scmp.lt.u32.totalorder %s319_s24, %s480_s2 }
   0x6   :  { %p325_p2 = pnand %p323_p1, %p320_p0 }
   0x8   :  { %328 = shalt.err (!%p325_p2)
}
   0x9   :  { %s329_s29 = scalar_lea.vmem %s33_s19, 16  ;;  %s333_s30 = scalar_lea.vmem %s33_s19, 32 }
   0xa   :  { %p330_p3 = scmp.ne.s32.totalorder %s33_s19, %s329_s29  ;;  %p334_p4 = scmp.lt.s32.totalorder %s33_s19, %s33_s19 }
   0xb   :  { %p335_p5 = scmp.lt.s32.totalorder %s333_s30, %s329_s29 }
   0xd   :  { %p336_p6 = por %p335_p5, %p334_p4 }
   0xf   :  { %p337_p7 = pnand %p336_p6, %p330_p3 }
  0x11   :  { %340 = shalt.err (!%p337_p7)
}
  0x12   :  { %35 = dma.hbm_to_vmem [thread:$0]  %s480_s2, 16, %s33_s19, [#allocation5]  }
  0x13   :  { %s341_s10 = scalar_lea.hbm %s479_s1, 256 }
  0x14   :  { %p342_p8 = scmp.ne.s32.totalorder %s479_s1, %s341_s10  ;;  %p345_p9 = scmp.lt.u32.totalorder %s341_s10, %s479_s1 }
  0x16   :  { %p347_p10 = pnand %p345_p9, %p342_p8 }
  0x18   :  { %350 = shalt.err (!%p347_p10)
}
  0x19   :  { %s351_s15 = scalar_lea.vmem %s426_s21, 256  ;;  %p356_p12 = scmp.lt.s32.totalorder %s426_s21, %s426_s21 }
  0x1a   :  { %p352_p11 = scmp.ne.s32.totalorder %s426_s21, %s351_s15  ;;  %p357_p13 = scmp.lt.s32.totalorder %s351_s15, %s351_s15 }
  0x1c   :  { %p358_p0 = por %p357_p13, %p356_p12 }
  0x1e   :  { %p359_p1 = pnand %p358_p0, %p352_p11 }
  0x20   :  { %362 = shalt.err (!%p359_p1)
}
  0x21   :  { %s391_s2 = smov 64   ;;  %s392_s16 = smov 4  }
  0x22   :  { %25 = dma.hbm_to_vmem [thread:$0]  %s479_s1, 256, %s426_s21, [#allocation3], %s391_s2, %s391_s2, %s392_s16  }
  0x23   :  { %s393_s19 = smov [#allocation6]   ;;  %s363_s24 = scalar_lea.hbm %s481_s3, 1024 }
  0x24   :  { %s41_s20 = sshll.u32 %s393_s19, 4  ;;  %p364_p2 = scmp.ne.s32.totalorder %s481_s3, %s363_s24  ;;  %s42_s20 = int_to_ptr.vmem [resolvable:$true] %s41_s20 }
  0x25   :  { %p367_p3 = scmp.lt.u32.totalorder %s363_s24, %s481_s3 }
  0x27   :  { %p369_p4 = pnand %p367_p3, %p364_p2 }
  0x29   :  { %372 = shalt.err (!%p369_p4)
}
  0x2a   :  { %s373_s29 = scalar_lea.vmem %s42_s20, 1024  ;;  %p378_p6 = scmp.lt.s32.totalorder %s42_s20, %s42_s20 }
  0x2b   :  { %p374_p5 = scmp.ne.s32.totalorder %s42_s20, %s373_s29  ;;  %p379_p7 = scmp.lt.s32.totalorder %s373_s29, %s373_s29 }
  0x2d   :  { %p380_p8 = por %p379_p7, %p378_p6 }
  0x2f   :  { %p381_p9 = pnand %p380_p8, %p374_p5 }
  0x31   :  { %384 = shalt.err (!%p381_p9)
}
  0x32   :  { %47 = dma.hbm_to_vmem [thread:$0]  %s481_s3, 1024, %s42_s20, [#allocation5], %s391_s2, %s391_s2, %s392_s16  }
  0x33   :  { %385 = dma.done.wait [#allocation3], 256  }
  0x34   :  { %386 = vsyncadd [#allocation3], 4294967040 }
  0x35   :  { %387 = dma.done.wait [#allocation5], 1040  }
  0x36   :  { %388 = vsyncadd [#allocation5], 4294966256  ;;  %v394_v0 = vmov 0.0   ;;  %vm395_vm0 = vmmov 0   ;;  %v309_v1 = vld [vmem:[#allocation2] sm:$0xff]   ;;  %v310_v2 = vld [vmem:[#allocation2 + $0x8] sm:$0xff]  }
  0x37   :  { %274 = vmatprep.subr.bf16.mxu0 %v394_v0  ;;  %278 = vmatprep.mubr.msk.bf16.mxu0 %vm395_vm0, %v394_v0  ;;  %v60_v3 = vld [vmem:[%s478_s0] sm:$0xff]  ;;  %vm85_vm1 = vcmask 261120   ;;  %v313_v7 = vld [vmem:[#allocation6 + $0x10] sm:$0xff]   ;;  %v314_v8 = vld [vmem:[#allocation6 + $0x18] sm:$0xff]  }
  0x38   :  { %282 = vmatprep.subr.bf16.mxu1 %v394_v0  ;;  %298 = vmatprep.mubr.msk.bf16.mxu1 %vm395_vm0, %v394_v0  ;;  %v311_v4 = vld [vmem:[#allocation6] sm:$0xff]   ;;  %v61_v5 = vpack.c.bf16 %v60_v3, %v60_v3  ;;  %v312_v6 = vld [vmem:[#allocation6 + $0x8] sm:$0xff]   ;;  %v317_v11 = vld [vmem:[#allocation6 + $0x30] sm:$0xff]  }
  0x39   :  { %275 = vmatpush3.bf16.msra.mxu0 %v309_v1  ;;  %283 = vmatpush3.bf16.msra.mxu1 %v311_v4  ;;  %v315_v9 = vld [vmem:[#allocation6 + $0x20] sm:$0xff]   ;;  %v316_v10 = vld [vmem:[#allocation6 + $0x28] sm:$0xff]   ;;  %v318_v12 = vld [vmem:[#allocation6 + $0x38] sm:$0xff]  }
  0x3a   :  { %276 = vmatprep.subr.bf16.mxu0 %v394_v0  ;;  %284 = vmatprep.subr.bf16.mxu1 %v394_v0  ;;  %v249_v13 = vld [vmem:[#allocation4] ss:$0 sm:$0xff]  ;;  %v253_v21 = vld [vmem:[%s482_s4] ss:$0 sm:$0xff] }
  0x3d   :  { %277 = vmatpush3.bf16.msra.mxu0 %v310_v2  ;;  %285 = vmatpush3.bf16.msra.mxu1 %v312_v6 }
  0x3e   :  { %286 = vmatprep.subr.bf16.mxu1 %v394_v0 }
  0x40   :  { %279 = vmatmul.mubr.msk.bf16.vlgmr.msra.gmra.mrb[0].mxu0 %vm85_vm1, %v61_v5 }
  0x41   :  { %287 = vmatpush3.bf16.msra.mxu1 %v313_v7 }
  0x42   :  { %288 = vmatprep.subr.bf16.mxu1 %v394_v0 }
  0x45   :  { %289 = vmatpush3.bf16.msra.mxu1 %v314_v8 }
  0x46   :  { %290 = vmatprep.subr.bf16.mxu1 %v394_v0 }
  0x49   :  { %291 = vmatpush3.bf16.msra.mxu1 %v315_v9 }
  0x4a   :  { %292 = vmatprep.subr.bf16.mxu1 %v394_v0 }
  0x4d   :  { %293 = vmatpush3.bf16.msra.mxu1 %v316_v10 }
  0x4e   :  { %294 = vmatprep.subr.bf16.mxu1 %v394_v0 }
  0x51   :  { %295 = vmatpush3.bf16.msra.mxu1 %v317_v11 }
  0x52   :  { %296 = vmatprep.subr.bf16.mxu1 %v394_v0 }
  0x55   :  { %297 = vmatpush3.bf16.msra.mxu1 %v318_v12 }
 0x113   :  { %v123_v14 = vpop.f32.mrb[0].mxu0 }
 0x114   :  { %v124_v15 = vadd.f32 %v249_v13, %v123_v14  ;;  %v280_v16 = vpop.f32.mrb[1].mxu0 }
 0x115   :  { %v126_v17 = vpop.f32.mrb[2].mxu0 }
 0x116   :  { %v129_v18 = vmax.f32 %v124_v15, 0.0  ;;  %v281_v19 = vpop.f32.mrb[3].mxu0 }
 0x118   :  { %v130_v20 = vpack.c.bf16 %v129_v18, %v129_v18 }
 0x11a   :  { %299 = vmatmul.mubr.bf16.vlgmr.msra.gmra.mrb[0].mxu1 %v130_v20 }
 0x1ed   :  { %v236_v22 = vpop.f32.mrb[0].mxu1 }
 0x1ee   :  { %v237_v23 = vadd.f32 %v253_v21, %v236_v22  ;;  %v300_v24 = vpop.f32.mrb[1].mxu1 }
 0x1ef   :  { %v239_v25 = vpop.f32.mrb[2].mxu1 }
 0x1f0   :  { %242 = vst [vmem:[%s483_s5] sm:$0xff] %v237_v23  ;;  %v301_v26 = vpop.f32.mrb[3].mxu1 }
 0x1f1   :  { %247 = vsyncpa [#allocation3], 1 }
 0x1f2   :  { %248 = vsyncpa [#allocation5], 1 }

</bundles_post_ra>
